<compile_context>
chip_gen: v7x
topology: tpu7x:2x2x1
jax: 0.10.0
libtpu: 0.0.40
codegen_flags: <defaults>
</compile_context>

<pallas_src>
import jax
import jax.numpy as jnp
from jax.experimental import pallas as pl
from jax.experimental.pallas import tpu as pltpu


def _sq_relu_kernel(x_ref, o_ref):
    x = x_ref[...]
    r = jnp.maximum(x, jnp.zeros_like(x))
    o_ref[...] = r * r


def squared_relu(x, *, block_bytes=2 * 1024 * 1024, donate_input=False):
    """Elementwise squared ReLU: (max(x, 0))**2, preserving shape/dtype."""
    orig_shape = x.shape
    dtype = x.dtype
    n = x.size
    itemsize = jnp.dtype(dtype).itemsize
    # Sublane packing: f32 -> 8 rows/vreg, bf16/f16 -> 16, int8/fp8 -> 32.
    sublane = {4: 8, 2: 16, 1: 32}.get(itemsize, 8)

    # Widest lane-dense last dim that divides n exactly (fewer, larger DMAs,
    # fully unmasked stores). Fall back to 128.
    lane = 128
    for cand in (1024, 512, 256):
        if n % cand == 0:
            lane = cand
            break

    x_flat = jnp.ravel(x)
    padded = (n % lane) != 0
    if padded:
        # Only pad up to a (sublane * lane)-element multiple — not a full tile.
        chunk = sublane * lane
        n_pad = pl.cdiv(n, chunk) * chunk
        x_flat = jnp.concatenate([x_flat, jnp.zeros((n_pad - n,), dtype=dtype)])
    else:
        n_pad = n

    rows = n_pad // lane
    x2d = x_flat.reshape(rows, lane)

    # Row-block size from the byte budget, aligned to sublane packing.
    tile_rows = max(sublane, block_bytes // (lane * itemsize))
    tile_rows = min(tile_rows, rows)
    if tile_rows < rows:
        # Ragged last block is masked by Pallas; block dims stay (8,128)-aligned.
        tile_rows = max(sublane, (tile_rows // sublane) * sublane)

    grid = (pl.cdiv(rows, tile_rows),)

    out2d = pl.pallas_call(
        _sq_relu_kernel,
        out_shape=jax.ShapeDtypeStruct((rows, lane), dtype),
        grid_spec=pltpu.PrefetchScalarGridSpec(
            num_scalar_prefetch=0,
            grid=grid,
            in_specs=[pl.BlockSpec((tile_rows, lane), lambda i: (i, 0))],
            out_specs=pl.BlockSpec((tile_rows, lane), lambda i: (i, 0)),
        ),
        compiler_params=pltpu.CompilerParams(
            dimension_semantics=("parallel",),
        ),
        # Opt-in in-place variant (mirrors SquaredReLU(inplace=True)): writes
        # the result over the input slab, saving an output HBM allocation.
        # Default off so the caller's `x` is never clobbered / force-copied.
        input_output_aliases=({0: 0} if donate_input else {}),
    )(x2d)

    if padded:
        return out2d.reshape(-1)[:n].reshape(orig_shape)
    return out2d.reshape(orig_shape)


if __name__ == "__main__":
    key = jax.random.PRNGKey(0)
    # Small NCHW-style input consistent with typical use of SquaredReLU.
    x = jax.random.normal(key, (2, 4, 16, 16), dtype=jnp.float32)

    sq_relu = jax.jit(squared_relu)
    out = jax.block_until_ready(sq_relu(x))

    # Reference check in plain JAX.
    ref = jnp.square(jnp.maximum(x, 0.0))
    assert out.shape == x.shape and out.dtype == x.dtype
    assert jnp.allclose(out, ref, atol=1e-6, rtol=1e-6)

    # Ragged / padded path check (element count not a multiple of 128).
    x2 = jax.random.normal(jax.random.PRNGKey(1), (3, 5, 7, 11), dtype=jnp.float32)
    out2 = jax.block_until_ready(jax.jit(squared_relu)(x2))
    ref2 = jnp.square(jnp.maximum(x2, 0.0))
    assert out2.shape == x2.shape and out2.dtype == x2.dtype
    assert jnp.allclose(out2, ref2, atol=1e-6, rtol=1e-6)

    print("KERNEL_OK")
</pallas_src>

<mosaic_0001>
module attributes {stable_mosaic.version = 11 : i64} {
  func.func @_sq_relu_kernel(%arg0: i32, %arg1: memref<2x1024xf32, #tpu.memory_space<vmem>>, %arg2: memref<2x1024xf32, #tpu.memory_space<vmem>>) attributes {dimension_semantics = [#tpu.dimension_semantics<parallel>], iteration_bounds = array<i64: 1>, scalar_prefetch = 0 : i64, scratch_operands = 0 : i64, tpu.core_type = #tpu.core_type<tc>, window_params = [{transform_indices = @transform_0, window_bounds = array<i64: 2, 1024>}, {transform_indices = @transform_1, window_bounds = array<i64: 2, 1024>}]} {
    %c0 = arith.constant 0 : index
    %c0_0 = arith.constant 0 : index
    %0 = vector.load %arg1[%c0, %c0_0] : memref<2x1024xf32, #tpu.memory_space<vmem>>, vector<2x1024xf32>
    %cst = arith.constant 0.000000e+00 : f32
    %1 = vector.broadcast %cst : f32 to vector<2x1024xf32>
    %2 = arith.maximumf %0, %1 : vector<2x1024xf32>
    %3 = arith.mulf %2, %2 : vector<2x1024xf32>
    %c0_1 = arith.constant 0 : index
    %c0_2 = arith.constant 0 : index
    %4 = vector.load %arg2[%c0_1, %c0_2] : memref<2x1024xf32, #tpu.memory_space<vmem>>, vector<2x1024xf32>
    tpu.vector_store %arg2[%c0_1, %c0_2], %3 {strides = array<i32>} : memref<2x1024xf32, #tpu.memory_space<vmem>>, vector<2x1024xf32>,
    return
  }
  func.func @transform_0(%arg0: i32) -> (i32, i32) {
    %c0_i32 = arith.constant 0 : i32
    %c0_i32_0 = arith.constant 0 : i32
    return %arg0, %c0_i32 : i32, i32
  }
  func.func @transform_1(%arg0: i32) -> (i32, i32) {
    %c0_i32 = arith.constant 0 : i32
    %c0_i32_0 = arith.constant 0 : i32
    return %arg0, %c0_i32 : i32, i32
  }
}

</mosaic_0001>

<bundles_post_ra>
// kernel: squared_relu.1
= control target key start
LH: loop header
LB: loop body
LE: loop exit
PB: predicated region body
PF: predicated region fallthrough
CT: control target
= control target key end

     0   :  { %s42_s0 = inlined_call_operand.vmem [shape: f32[2,1024], index: 0, kind: input, shape index: {}]   ;;  %s43_s1 = inlined_call_operand.vmem [shape: f32[2,1024], index: 1, kind: output, shape index: {}]  }
   0x1   :  { %v8_v0 = vld [vmem:[%s42_s0] sm:$0xff]  ;;  %v9_v1 = vld [vmem:[%s42_s0 + $0x8] sm:$0xff] }
   0x2   :  { %v10_v2 = vmax.f32 %v8_v0, 0.0  ;;  %v11_v3 = vmax.f32 %v9_v1, 0.0 }
   0x4   :  { %v12_v4 = vmul.f32 %v10_v2, %v10_v2  ;;  %v13_v5 = vmul.f32 %v11_v3, %v11_v3 }
   0x6   :  { %14 = vst [vmem:[%s43_s1] sm:$0xff] %v12_v4  ;;  %15 = vst [vmem:[%s43_s1 + $0x8] sm:$0xff] %v13_v5 }

</bundles_post_ra>
